<compile_context>
chip_gen: v7x
topology: tpu7x:2x2x1
jax: 0.10.0
libtpu: 0.0.40
codegen_flags: <defaults>
</compile_context>

<pallas_src>
import math
import functools

import jax
import jax.numpy as jnp
from jax.experimental import pallas as pl
from jax.experimental.pallas import tpu as pltpu

LANE = 128  # lane (last-dim) granule for every dtype


def _round_up(x, m):
    return ((x + m - 1) // m) * m


def _sublane_multiple(dtype):
    """Minimum packed sublane multiple (second-to-last dim) for a dtype."""
    itemsize = jnp.dtype(dtype).itemsize
    if itemsize >= 4:
        return 8
    if itemsize == 2:
        return 16
    return 32


def _pick_tile(padded_dim, want, granule):
    """Largest multiple of `granule` that is <= `want` and divides `padded_dim`.

    `padded_dim` is always a multiple of `granule`, so the loop terminates at
    `granule` in the worst case -> the arrays never need padding beyond the
    hardware granule (no oversized jnp.pad copies, no dead MXU work)."""
    t = min(want, padded_dim)
    t = max(granule, (t // granule) * granule)
    while padded_dim % t:
        t -= granule
    return t


# --------------------------------------------------------------------------
# Kernels
# --------------------------------------------------------------------------
def _linear_kernel_f32_out(x_ref, w_ref, b_ref, o_ref):
    """f32 output: accumulate directly into the output block (resident across
    the K grid axis) — no scratch, no memset, no epilogue copy."""
    k = pl.program_id(2)
    p = jnp.dot(x_ref[...], w_ref[...], preferred_element_type=jnp.float32)

    @pl.when(k == 0)
    def _():
        o_ref[...] = p + b_ref[...].astype(jnp.float32)

    @pl.when(k > 0)
    def _():
        o_ref[...] += p


def _linear_kernel_acc(x_ref, w_ref, b_ref, o_ref, acc_ref):
    """Non-f32 output: f32 VMEM accumulator, cast on the last K step."""
    k = pl.program_id(2)
    p = jnp.dot(x_ref[...], w_ref[...], preferred_element_type=jnp.float32)

    @pl.when(k == 0)
    def _():
        acc_ref[...] = p + b_ref[...].astype(jnp.float32)

    @pl.when(k > 0)
    def _():
        acc_ref[...] += p

    @pl.when(k == pl.num_programs(2) - 1)
    def _():
        o_ref[...] = acc_ref[...].astype(o_ref.dtype)


# --------------------------------------------------------------------------
# Parameter preparation (one-time, outside the hot path)
# --------------------------------------------------------------------------
def prepare_params(weight, bias=None, compute_dtype=None):
    """Re-lay-out the PyTorch-layout weight (out_features, in_features) into a
    padded (Kp, Np) = (in_features, out_features) matrix plus a padded (1, Np)
    bias row.  Call ONCE per parameter set and reuse — this replaces the
    per-forward weight.T + jnp.pad HBM round-trips.

    compute_dtype: optional reduced-precision MXU dtype (e.g. jnp.bfloat16) —
    accuracy-affecting; accumulation in the kernel remains f32."""
    N, K = weight.shape
    Kp = _round_up(K, LANE)
    Np = _round_up(N, LANE)
    w_kn = weight.T  # (K, N): MXU contracts directly, N is the lane-dense axis
    if (Kp, Np) != (K, N):
        w_kn = jnp.pad(w_kn, ((0, Kp - K), (0, Np - N)))
    if compute_dtype is not None:
        w_kn = w_kn.astype(compute_dtype)
    if bias is None:
        b2 = jnp.zeros((1, Np), dtype=weight.dtype)
    else:
        b2 = bias.reshape(1, N)
        if Np != N:
            b2 = jnp.pad(b2, ((0, 0), (0, Np - N)))
    return w_kn, b2


# --------------------------------------------------------------------------
# Forward
# --------------------------------------------------------------------------
@functools.partial(jax.jit, static_argnames=("n_out", "tm", "tn", "tk"))
def linear_forward(x, w_kn, b2, *, n_out, tm=512, tn=512, tk=1024):
    """y = x @ W^T + b  with W supplied pre-transposed/padded as (Kp, Np) by
    prepare_params().  Flattens leading dims, runs a 3-D tiled, double-buffered
    Pallas matmul with an f32 accumulator resident across the K grid axis."""
    orig_shape = x.shape
    out_dtype = x.dtype
    x2 = x.reshape(-1, orig_shape[-1])
    if x2.dtype != w_kn.dtype:
        # Opt-in reduced-precision MXU path (prepare_params(..., compute_dtype=...)).
        x2 = x2.astype(w_kn.dtype)
    M, K = x2.shape
    Kp, Np = w_kn.shape
    assert K <= Kp and Kp % LANE == 0 and Np % LANE == 0
    assert n_out <= Np

    # --- minimal, dtype-aware padding of the activations -------------------
    sub_m = max(_sublane_multiple(x2.dtype), _sublane_multiple(out_dtype))
    Mp = _round_up(M, sub_m)
    if (Mp, Kp) != (M, K):
        x2 = jnp.pad(x2, ((0, Mp - M), (0, Kp - K)))  # zero K-pad: no-op in dot

    # --- tile selection: big (bandwidth-roofline) tiles that divide the
    #     padded dims exactly, so there is never pad-to-tile waste -----------
    tm = _pick_tile(Mp, tm, sub_m)
    tn = _pick_tile(Np, tn, LANE)
    tk = _pick_tile(Kp, tk, LANE)

    # v7x megacore: its 2 TensorCores shard the "parallel" grid axes.  Ensure
    # at least one parallel axis has >= 2 tiles, preferring to split M so the
    # wide lane-dense N tile is kept for small-M (decode-like) calls.
    if Mp // tm == 1 and Np // tn == 1:
        if Mp >= 2 * sub_m:
            tm = _pick_tile(Mp, max(sub_m, Mp // 2), sub_m)
        elif Np >= 2 * LANE:
            tn = _pick_tile(Np, max(LANE, Np // 2), LANE)

    grid = (Mp // tm, Np // tn, Kp // tk)

    in_itemsize = jnp.dtype(x2.dtype).itemsize
    w_itemsize = jnp.dtype(w_kn.dtype).itemsize
    out_itemsize = jnp.dtype(out_dtype).itemsize

    f32_out = out_dtype == jnp.float32
    if f32_out:
        kernel = _linear_kernel_f32_out
        scratch_shapes = []
    else:
        kernel = _linear_kernel_acc
        scratch_shapes = [pltpu.VMEM((tm, tn), jnp.float32)]

    # VMEM budget: double-buffered x / W / output tiles (+ f32 scratch for
    # non-f32 outputs).  Defaults (512/512/1024, f32) come to ~11 MiB.  Cap the
    # scoped limit at 64 MiB so a v6e-sized tile config never overruns v7x,
    # and always raise it above v5e's 16 MiB scoped default.
    vmem_est = (
        2 * (tm * tk * in_itemsize + tk * tn * w_itemsize)
        + 2 * tm * tn * out_itemsize
        + 2 * tn * w_itemsize
        + (0 if f32_out else tm * tn * 4)
    )
    vmem_limit = int(min(64 * 2**20, max(32 * 2**20, vmem_est * 3 // 2 + 8 * 2**20)))

    # HBM traffic including grid re-reads of x (per N tile) and W (per M tile).
    cost = pl.CostEstimate(
        flops=2 * Mp * Np * Kp,
        transcendentals=0,
        bytes_accessed=(
            Mp * Kp * in_itemsize * grid[1]
            + Kp * Np * w_itemsize * grid[0]
            + Np * w_itemsize * grid[0]
            + Mp * Np * out_itemsize
        ),
    )

    out = pl.pallas_call(
        kernel,
        out_shape=jax.ShapeDtypeStruct((Mp, Np), out_dtype),
        grid_spec=pltpu.PrefetchScalarGridSpec(
            num_scalar_prefetch=0,
            grid=grid,
            in_specs=[
                pl.BlockSpec((tm, tk), lambda i, j, k: (i, k)),   # x tile
                pl.BlockSpec((tk, tn), lambda i, j, k: (k, j)),   # W^T tile (K, N)
                pl.BlockSpec((1, tn), lambda i, j, k: (0, j)),    # bias tile
            ],
            out_specs=pl.BlockSpec((tm, tn), lambda i, j, k: (i, j)),
            scratch_shapes=scratch_shapes,
        ),
        compiler_params=pltpu.CompilerParams(
            dimension_semantics=("parallel", "parallel", "arbitrary"),
            vmem_limit_bytes=vmem_limit,
        ),
        cost_estimate=cost,
    )(x2, w_kn, b2)

    out = out[:M, :n_out]
    return out.reshape(*orig_shape[:-1], n_out)


def linear_forward_torch_layout(x, weight, bias=None, **kw):
    """Convenience wrapper taking the PyTorch-layout (out, in) weight.
    NOTE: re-lays-out the weight on every call; for repeated forwards with a
    fixed weight, call prepare_params() once and use linear_forward()."""
    w_kn, b2 = prepare_params(weight, bias)
    return linear_forward(x, w_kn, b2, n_out=weight.shape[0], **kw)


def init_params(key, in_features, out_features, dtype=jnp.float32):
    """Matches the module's init (world size 1):
    weight ~ kaiming_uniform_(a=sqrt(5)) == U(-1/sqrt(fan_in), 1/sqrt(fan_in)),
    bias   = zeros(local_out_features) (== out_features at world size 1)."""
    bound = 1.0 / math.sqrt(in_features)
    weight = jax.random.uniform(
        key, (out_features, in_features), dtype=dtype, minval=-bound, maxval=bound
    )
    bias = jnp.zeros((out_features,), dtype=dtype)
    return weight, bias


if __name__ == "__main__":
    # Small shapes consistent with the forward: x: (batch, seq, in_features)
    batch, seq, in_features, out_features = 2, 8, 32, 64

    key = jax.random.PRNGKey(0)
    kx, kw = jax.random.split(key)

    x = jax.random.normal(kx, (batch, seq, in_features), dtype=jnp.float32)
    weight, bias = init_params(kw, in_features, out_features)

    # One-time weight re-layout (do NOT redo this every forward call).
    w_kn, b2 = prepare_params(weight, bias)

    y = linear_forward(x, w_kn, b2, n_out=out_features)
    y = jax.block_until_ready(y)

    # Reference (plain JAX) — same math as torch: x.matmul(W.t()) + bias
    y_ref = jnp.einsum("bsk,nk->bsn", x, weight) + bias
    assert y.shape == (batch, seq, out_features)
    assert jnp.allclose(y, y_ref, atol=1e-5, rtol=1e-5)

    print("KERNEL_OK")
</pallas_src>

<mosaic_0001>
module attributes {stable_mosaic.version = 11 : i64} {
  func.func @_linear_kernel_f32_out(%arg0: i32, %arg1: i32, %arg2: i32, %arg3: memref<8x128xf32, #tpu.memory_space<vmem>>, %arg4: memref<128x128xf32, #tpu.memory_space<vmem>>, %arg5: memref<1x128xf32, #tpu.memory_space<vmem>>, %arg6: memref<8x128xf32, #tpu.memory_space<vmem>>) attributes {dimension_semantics = [#tpu.dimension_semantics<parallel>, #tpu.dimension_semantics<parallel>, #tpu.dimension_semantics<arbitrary>], iteration_bounds = array<i64: 2, 1, 1>, scalar_prefetch = 0 : i64, scratch_operands = 0 : i64, tpu.core_type = #tpu.core_type<tc>, window_params = [{transform_indices = @transform_0, window_bounds = array<i64: 8, 128>}, {transform_indices = @transform_1, window_bounds = array<i64: 128, 128>}, {transform_indices = @transform_2, window_bounds = array<i64: 1, 128>}, {transform_indices = @transform_3, window_bounds = array<i64: 8, 128>}]} {
    %c0 = arith.constant 0 : index
    %c0_0 = arith.constant 0 : index
    %0 = vector.load %arg3[%c0, %c0_0] : memref<8x128xf32, #tpu.memory_space<vmem>>, vector<8x128xf32>
    %c0_1 = arith.constant 0 : index
    %c0_2 = arith.constant 0 : index
    %1 = vector.load %arg4[%c0_1, %c0_2] : memref<128x128xf32, #tpu.memory_space<vmem>>, vector<128x128xf32>
    %cst = arith.constant dense<0.000000e+00> : vector<8x128xf32>
    %2 = tpu.matmul %0, %1, %cst {dimension_numbers = #tpu.dot_dimension_numbers<[1], [0], [0], [1], [0, 0, 1, 1], [], []>} : vector<8x128xf32>, vector<128x128xf32>, vector<8x128xf32> -> vector<8x128xf32>
    %c0_i32 = arith.constant 0 : i32
    %3 = arith.cmpi eq, %arg2, %c0_i32 : i32
    %4 = arith.extui %3 : i1 to i32
    %c0_i32_3 = arith.constant 0 : i32
    %5 = arith.cmpi ne, %4, %c0_i32_3 : i32
    scf.if %5 {
      %c0_6 = arith.constant 0 : index
      %c0_7 = arith.constant 0 : index
      %9 = vector.load %arg5[%c0_6, %c0_7] : memref<1x128xf32, #tpu.memory_space<vmem>>, vector<1x128xf32>
      %10 = vector.broadcast %9 : vector<1x128xf32> to vector<8x128xf32>
      %11 = arith.addf %2, %10 : vector<8x128xf32>
      %c0_8 = arith.constant 0 : index
      %c0_9 = arith.constant 0 : index
      %12 = vector.load %arg6[%c0_8, %c0_9] : memref<8x128xf32, #tpu.memory_space<vmem>>, vector<8x128xf32>
      tpu.vector_store %arg6[%c0_8, %c0_9], %11 {strides = array<i32>} : memref<8x128xf32, #tpu.memory_space<vmem>>, vector<8x128xf32>,
    } else {
    }
    %c0_i32_4 = arith.constant 0 : i32
    %6 = arith.cmpi sgt, %arg2, %c0_i32_4 : i32
    %7 = arith.extui %6 : i1 to i32
    %c0_i32_5 = arith.constant 0 : i32
    %8 = arith.cmpi ne, %7, %c0_i32_5 : i32
    scf.if %8 {
      %c0_6 = arith.constant 0 : index
      %c0_7 = arith.constant 0 : index
      %9 = vector.load %arg6[%c0_6, %c0_7] : memref<8x128xf32, #tpu.memory_space<vmem>>, vector<8x128xf32>
      %10 = arith.addf %9, %2 : vector<8x128xf32>
      %c0_8 = arith.constant 0 : index
      %c0_9 = arith.constant 0 : index
      %11 = vector.load %arg6[%c0_8, %c0_9] : memref<8x128xf32, #tpu.memory_space<vmem>>, vector<8x128xf32>
      tpu.vector_store %arg6[%c0_8, %c0_9], %10 {strides = array<i32>} : memref<8x128xf32, #tpu.memory_space<vmem>>, vector<8x128xf32>,
    } else {
    }
    return
  }
  func.func @transform_0(%arg0: i32, %arg1: i32, %arg2: i32) -> (i32, i32) {
    %c0_i32 = arith.constant 0 : i32
    return %arg0, %arg2 : i32, i32
  }
  func.func @transform_1(%arg0: i32, %arg1: i32, %arg2: i32) -> (i32, i32) {
    %c0_i32 = arith.constant 0 : i32
    return %arg2, %arg1 : i32, i32
  }
  func.func @transform_2(%arg0: i32, %arg1: i32, %arg2: i32) -> (i32, i32) {
    %c0_i32 = arith.constant 0 : i32
    %c0_i32_0 = arith.constant 0 : i32
    return %c0_i32, %arg1 : i32, i32
  }
  func.func @transform_3(%arg0: i32, %arg1: i32, %arg2: i32) -> (i32, i32) {
    %c0_i32 = arith.constant 0 : i32
    return %arg0, %arg1 : i32, i32
  }
}

</mosaic_0001>

<bundles_post_ra>
// kernel: linear_forward.1
= control target key start
LH: loop header
LB: loop body
LE: loop exit
PB: predicated region body
PF: predicated region fallthrough
CT: control target
= control target key end

     0   :  { %8 = vsyncpa [#allocation3], 0  ;;  %s669_s12 = smov 0   ;;  %s671_s13 = smov 0   ;;  %s748_s0 = inlined_call_operand.vmem [shape: f32[16,128], index: 0, kind: input, shape index: {}]   ;;  %s749_s1 = inlined_call_operand.hbm [shape: f32[128,128], index: 1, kind: input, shape index: {}]   ;;  %s750_s2 = inlined_call_operand.vmem [shape: f32[1,128], index: 2, kind: input, shape index: {}]   ;;  %s751_s3 = inlined_call_operand.vmem [shape: f32[16,128], index: 3, kind: output, shape index: {}]  }
   0x1   :  { %s673_s14 = smov 0  }
   0x2 LB: > { %s458_s15 = sadd.s32 4294967295, %s641_s14   ;;  %s33_s16 = sadd.s32 1, %s637_s13  ;;  %s641_s14 = sphi %s673_s14, %s14_s14   ;;  %s637_s13 = sphi %s671_s13, %s761_s13   ;;  %s633_s12 = sphi %s669_s12, %s760_s12  }
   0x3   : > { %p35_p0 = scmp.ge.s32.totalorder %s33_s16, 2  ;;  %p460_p1 = scmp.ge.s32.totalorder %s641_s14, 1 }
   0x4   : > { %p148_p2 = scmp.lt.s32.totalorder %s641_s14, 3  ;;  %p694_p4 = scmp.eq.s32.totalorder %s458_s15, 0 }
   0x5   : > { %s763_s16 = smov (%p35_p0, %s33_s16), 0  ;;  %s643_s19 = smov [#allocation2]  }
   0x6   : > { %p690_p3 = pnand %p460_p1, %p148_p2  ;;  %s164_s20 = sshll.u32 %s643_s19, 4  ;;  %s165_s20 = int_to_ptr.vmem [resolvable:$true] %s164_s20 }
   0x7   : > { %s756_s18 = scalar_select %p694_p4, 1, 0 }
   0x8   : > { %s755_s17 = scalar_select %p690_p3, 1, 0 }
   0x9   : > { %p551_p5 = pneg %p690_p3  ;;  %s587_s24 = scalar_lea.hbm %s749_s1, 2048 }
   0xa   : > { %p588_p7 = scmp.ne.s32.totalorder %s749_s1, %s587_s24  ;;  %p594_p11 = scmp.lt.u32.totalorder %s587_s24, %s749_s1 }
   0xb   : > { %p702_p6 = pnand %p694_p4, %p551_p5 }
   0xd   : > { %p589_p8 = pneg %p702_p6 }
   0xf   : > { %p590_p9 = pnand %p589_p8, %p588_p7 }
  0x11   : > { %p591_p10 = pneg %p590_p9 }
  0x13   : > { %p596_p12 = pnand %p594_p11, %p591_p10 }
  0x15   : > { %599 = shalt.err (!%p596_p12)
}
  0x16   : > { %s600_s29 = scalar_lea.vmem %s165_s20, 2048  ;;  %p608_p2 = scmp.lt.s32.totalorder %s165_s20, %s165_s20 }
  0x17   : > { %p601_p13 = scmp.ne.s32.totalorder %s165_s20, %s600_s29  ;;  %p609_p5 = scmp.lt.s32.totalorder %s600_s29, %s600_s29 }
  0x19   : > { %p603_p0 = pnand %p601_p13, %p589_p8  ;;  %p610_p4 = por %p609_p5, %p608_p2 }
  0x1b   : > { %p604_p1 = pneg %p603_p0 }
  0x1d   : > { %p611_p3 = pnand %p610_p4, %p604_p1 }
  0x1f   : > { %614 = shalt.err (!%p611_p3)
}
  0x20   : > { %s644_s30 = smov 128   ;;  %s645_s4 = smov 8  }
  0x21   : > { %554 = dma.hbm_to_vmem [thread:$0]  (!%p702_p6), %s749_s1, 2048, %s165_s20, [#allocation3], %s644_s30, %s644_s30, %s645_s4  }
  0x22   : > { %p758_p7 = scmp.ne.s32.totalorder %s755_s17, 0 }
  0x23   : > { %p759_p9 = scmp.ne.s32.totalorder (!%p758_p7), %s756_s18, 0 }
  0x24   : > { %196 = sbr.rel (%p758_p7) target bundleno = 294 (0x126), region = 32 }
  0x2b   : > { %628 = dma.done.wait (%p759_p9), [#allocation3], 2048  }
  0x2c   : > { %630 = vsyncadd (%p759_p9), [#allocation3], 4294965248  ;;  %v646_v0 = vmov 0.0|0.0   ;;  %vm647_vm0 = vmmov 0   ;;  %v648_v1 = vmov 0.0   ;;  %v246_v2 = vld [vmem:[#allocation2] sm:$0xff] }
  0x2d   : > { %523 = vmatprep.subr.bf16.mxu0 %v646_v0  ;;  %520 = vmatprep.mubr.msk.f32.mxu0 %vm647_vm0, %v648_v1  ;;  %v247_v3 = vld [vmem:[#allocation2 + $0x8] sm:$0xff]  ;;  %v248_v4 = vld [vmem:[#allocation2 + $0x10] sm:$0xff]  ;;  %v249_v6 = vld [vmem:[#allocation2 + $0x18] sm:$0xff]  ;;  %p227_p3 = scmp.lt.s32.totalorder %s633_s12, 1 }
  0x2e   : > { %v524_v5 = vpack.c.bf16 %v247_v3, %v246_v2  ;;  %v527_v7 = vpack.c.bf16 %v249_v6, %v248_v4  ;;  %v250_v8 = vld [vmem:[#allocation2 + $0x20] sm:$0xff]  ;;  %v251_v9 = vld [vmem:[#allocation2 + $0x28] sm:$0xff]  ;;  %v252_v11 = vld [vmem:[#allocation2 + $0x30] sm:$0xff] }
  0x2f   : > { %v530_v10 = vpack.c.bf16 %v251_v9, %v250_v8  ;;  %v253_v12 = vld [vmem:[#allocation2 + $0x38] sm:$0xff]  ;;  %v254_v14 = vld [vmem:[#allocation2 + $0x40] sm:$0xff]  ;;  %v255_v15 = vld [vmem:[#allocation2 + $0x48] sm:$0xff]  ;;  %s765_s12 = smov (!%p227_p3, %s633_s12), 1 }
  0x30   : > { %525 = vmatpush3.bf16.msra.mxu0 %v524_v5  ;;  %v533_v13 = vpack.c.bf16 %v253_v12, %v252_v11  ;;  %v536_v16 = vpack.c.bf16 %v255_v15, %v254_v14  ;;  %v256_v17 = vld [vmem:[#allocation2 + $0x50] sm:$0xff]  ;;  %v257_v18 = vld [vmem:[#allocation2 + $0x58] sm:$0xff]  ;;  %v258_v20 = vld [vmem:[#allocation2 + $0x60] sm:$0xff]  ;;  %s466_s7 = sshll.u32 %s765_s12, 3 }
  0x31   : > { %526 = vmatprep.subr.bf16.mxu0 %v646_v0  ;;  %v539_v19 = vpack.c.bf16 %v257_v18, %v256_v17  ;;  %v259_v21 = vld [vmem:[#allocation2 + $0x68] sm:$0xff]  ;;  %v260_v23 = vld [vmem:[#allocation2 + $0x70] sm:$0xff]  ;;  %v261_v24 = vld [vmem:[#allocation2 + $0x78] sm:$0xff]  ;;  %s233_s10 = scalar_lea.vmem %s748_s0, %s466_s7  ;;  %s244_s19 = scalar_lea.vmem %s751_s3, %s466_s7 }
  0x32   : > { %v542_v22 = vpack.c.bf16 %v259_v21, %v258_v20  ;;  %v545_v25 = vpack.c.bf16 %v261_v24, %v260_v23  ;;  %v245_v26 = vld [vmem:[%s233_s10] sm:$0xff] }
  0x33   : > { %v468_v27 = vld [vmem:[%s750_s2] ss:$0 sm:$0xff] }
  0x34   : > { %528 = vmatpush3.bf16.msra.mxu0 %v527_v7 }
  0x35   : > { %529 = vmatprep.subr.bf16.mxu0 %v646_v0 }
  0x38   : > { %531 = vmatpush3.bf16.msra.mxu0 %v530_v10 }
  0x39   : > { %532 = vmatprep.subr.bf16.mxu0 %v646_v0 }
  0x3c   : > { %534 = vmatpush3.bf16.msra.mxu0 %v533_v13 }
  0x3d   : > { %535 = vmatprep.subr.bf16.mxu0 %v646_v0 }
  0x40   : > { %537 = vmatpush3.bf16.msra.mxu0 %v536_v16 }
  0x41   : > { %538 = vmatprep.subr.bf16.mxu0 %v646_v0 }
  0x44   : > { %540 = vmatpush3.bf16.msra.mxu0 %v539_v19 }
  0x45   : > { %541 = vmatprep.subr.bf16.mxu0 %v646_v0 }
  0x48   : > { %543 = vmatpush3.bf16.msra.mxu0 %v542_v22 }
  0x49   : > { %544 = vmatprep.subr.bf16.mxu0 %v646_v0 }
  0x4c   : > { %546 = vmatpush3.bf16.msra.mxu0 %v545_v25 }
  0x4f   : > { %521 = vmatmul.mubr.f32.vlgmr.msra.gmra.mrb[0].mxu0 %v245_v26 }
 0x122   : > { %v328_v28 = vpop.f32.mrb[0].mxu0 }
 0x123   : > { %v343_v29 = vadd.f32 %v468_v27, %v328_v28  ;;  %v522_v30 = vpop.f32.mrb[1].mxu0 }
 0x125   : > { %344 = vst [vmem:[%s244_s19] sm:$0xff] %v343_v29 }
 0x126 PF: > { %s14_s14 = sadd.s32 1, %s641_s14   ;;  %s760_s12 = smov %s637_s13 }
 0x127   : > { %p11_p4 = scmp.ge.s32.totalorder %s14_s14, 4   ;;  %s761_s13 = smov %s763_s16 }
 0x129   :  { %13 = sbr.rel (!%p11_p4) target bundleno = 2 (0x2), region = 79 }
 0x130   :  { %377 = vsyncpa [#allocation3], 1 }
 0x131   :  { %379 = vsyncpa [#allocation3 + $0x1], 1 }

</bundles_post_ra>
